<compile_context>
chip_gen: v6e
topology: v6e:2x2x1
jax: 0.10.0
libtpu: 0.0.40
codegen_flags: <defaults>
</compile_context>

<pallas_src>
import math

import numpy as np

import jax
import jax.numpy as jnp
from jax.experimental import pallas as pl
from jax.experimental.pallas import tpu as pltpu


_TWO_PI = 2.0 * math.pi
_TWO_PI_HI = 6.28125                 # exactly representable in f32 (= 201/32)
_TWO_PI_LO = _TWO_PI - _TWO_PI_HI    # small correction term


def _round_up(x: int, m: int) -> int:
    return ((x + m - 1) // m) * m


def _sinusoidal_kernel(t_ref, freqs_ref, phase_ref, out_ref):
    """t_ref: (TB, 1) f32; freqs_ref/phase_ref: (1, dim) f32; out_ref: (TB, dim)."""
    t = t_ref[...]                                   # (TB, 1)

    # Full-width argument: lanes [0, half) get phase 0 (sin), lanes
    # [half, 2*half) get phase pi/2 (cos(x) == sin(x + pi/2)); an odd-dim pad
    # lane has freq=0, phase=0 -> exactly 0.  Outer product + bias on the VPU.
    args = t * freqs_ref[...] + phase_ref[...]       # (TB, dim)

    # Cody-Waite mod-2*pi reduction (VPU work, free under the EUP sin
    # bottleneck).  Applied after the phase add so r stays in [-pi, pi];
    # keeps accuracy for large diffusion timesteps on every backend.
    n = jnp.floor(args * (1.0 / _TWO_PI) + 0.5)
    r = (args - n * _TWO_PI_HI) - n * _TWO_PI_LO

    # Single unmasked, lane-dense full-width store (no masked half stores,
    # no XLU lane shift).
    out_ref[...] = jnp.sin(r).astype(out_ref.dtype)


def sinusoidal_position_embeddings(time: jax.Array, dim: int, *,
                                   block_b: int = 1024,
                                   out_dtype=jnp.float32) -> jax.Array:
    """Pallas equivalent of SinusoidalPositionEmbeddings(dim)(time)."""
    assert time.ndim == 1, "time must be a 1-D vector of timesteps"
    assert dim >= 4, "dim must be >= 4 (half_dim - 1 must be positive)"
    b = time.shape[0]
    half_dim = dim // 2
    pad = dim - 2 * half_dim          # 0 (even dim) or 1 (odd dim)

    # freqs hoisted out of the kernel and extended to full lane width.
    scale = -math.log(10000.0) / (half_dim - 1)
    freqs = jnp.exp(jnp.arange(half_dim, dtype=jnp.float32) * scale)
    freqs_ext = jnp.concatenate(
        [freqs, freqs, jnp.zeros((pad,), jnp.float32)]).reshape(1, dim)
    phase = jnp.concatenate(
        [jnp.zeros((half_dim,), jnp.float32),
         jnp.full((half_dim,), 0.5 * math.pi, jnp.float32),
         jnp.zeros((pad,), jnp.float32)]).reshape(1, dim)

    # Batch tile: multiple of the sublane count for out_dtype; large by default
    # (per-grid-step overhead ~0.35us, tile sweeps peak around 512-1024 rows),
    # but capped so the grid has >= 2 steps whenever B allows it (v7x 2-TC split).
    sub = 16 if jnp.dtype(out_dtype) == jnp.dtype(jnp.bfloat16) else 8
    tb = max(sub, min(block_b, _round_up(b, sub)))
    tb = _round_up(tb, sub)
    if b > sub and _round_up(b, tb) // tb < 2:
        tb = max(sub, _round_up(pl.cdiv(b, 2), sub))
    b_pad = _round_up(b, tb)
    grid = b_pad // tb

    t2d = jnp.pad(time.astype(jnp.float32), (0, b_pad - b)).reshape(b_pad, 1)

    # VMEM budget: double-buffered (tb, dim) output block + the lane-padded
    # (tb, 1) -> (tb, 128) input block + the two (1, dim) constant rows.
    # Only raise the scoped limit when this exceeds v5e's 16 MiB default.
    out_itemsize = jnp.dtype(out_dtype).itemsize
    vmem_needed = 2 * tb * dim * out_itemsize + 2 * tb * 128 * 4 + 4 * dim * 4
    cp_kwargs = dict(dimension_semantics=("parallel",))
    if vmem_needed > 12 * 1024 * 1024:
        cp_kwargs["vmem_limit_bytes"] = int(vmem_needed * 1.5)

    cost = pl.CostEstimate(
        flops=9 * b_pad * dim,                 # outer product + bias + range reduction
        transcendentals=b_pad * dim,           # one sin per output element
        bytes_accessed=4 * b_pad + b_pad * dim * out_itemsize + 8 * dim,
    )

    out = pl.pallas_call(
        _sinusoidal_kernel,
        out_shape=jax.ShapeDtypeStruct((b_pad, dim), out_dtype),
        grid=(grid,),
        in_specs=[
            pl.BlockSpec((tb, 1), lambda i: (i, 0)),
            pl.BlockSpec((1, dim), lambda i: (0, 0)),
            pl.BlockSpec((1, dim), lambda i: (0, 0)),
        ],
        out_specs=pl.BlockSpec((tb, dim), lambda i: (i, 0)),
        compiler_params=pltpu.CompilerParams(**cp_kwargs),
        cost_estimate=cost,
    )(t2d, freqs_ext, phase)

    return out[:b]


def _reference_np(time: np.ndarray, dim: int) -> np.ndarray:
    """Float64 numpy reference mirroring the PyTorch forward (ground truth)."""
    t = np.asarray(time, dtype=np.float64)
    half_dim = dim // 2
    scale = math.log(10000.0) / (half_dim - 1)
    freqs = np.exp(np.arange(half_dim, dtype=np.float64) * -scale)
    args = t[:, None] * freqs[None, :]
    emb = np.concatenate([np.sin(args), np.cos(args)], axis=-1)
    if dim % 2 == 1:
        emb = np.pad(emb, ((0, 0), (0, 1)))
    return emb


if __name__ == "__main__":
    key = jax.random.PRNGKey(0)
    batch = 8

    # Deterministic diffusion-style timesteps in [0, 1000).
    time = jax.random.randint(key, (batch,), 0, 1000).astype(jnp.float32)

    # Main case: typical diffusion time-embedding width, lane-dense output.
    dim = 128
    out = jax.block_until_ready(sinusoidal_position_embeddings(time, dim))
    ref = _reference_np(np.asarray(time), dim)
    assert out.shape == (batch, dim)
    assert out.dtype == jnp.float32
    # f32 compute (t * freq products up to ~1e3) limits agreement with the
    # float64 ground truth to ~1e-4; 5e-3 gives margin while still catching
    # any structural bug (values are O(1)).
    err = float(np.max(np.abs(np.asarray(out, dtype=np.float64) - ref)))
    assert err < 5e-3, f"max abs error {err}"

    # Odd-dim case: exercises the zero-pad lane (freq=0, phase=0 -> 0).
    dim_odd = 65
    out_odd = jax.block_until_ready(sinusoidal_position_embeddings(time, dim_odd))
    ref_odd = _reference_np(np.asarray(time), dim_odd)
    assert out_odd.shape == (batch, dim_odd)
    err_odd = float(np.max(np.abs(np.asarray(out_odd, dtype=np.float64) - ref_odd)))
    assert err_odd < 5e-3, f"odd-dim max abs error {err_odd}"

    print("KERNEL_OK")
</pallas_src>

<mosaic_0001>
module attributes {stable_mosaic.version = 11 : i64} {
  func.func @_sinusoidal_kernel(%arg0: i32, %arg1: memref<8x1xf32, #tpu.memory_space<vmem>>, %arg2: memref<1x128xf32, #tpu.memory_space<vmem>>, %arg3: memref<1x128xf32, #tpu.memory_space<vmem>>, %arg4: memref<8x128xf32, #tpu.memory_space<vmem>>) attributes {dimension_semantics = [#tpu.dimension_semantics<parallel>], iteration_bounds = array<i64: 1>, scalar_prefetch = 0 : i64, scratch_operands = 0 : i64, tpu.core_type = #tpu.core_type<tc>, window_params = [{transform_indices = @transform_0, window_bounds = array<i64: 8, 1>}, {pipeline_mode = #tpu.pipeline_mode<synchronous>, transform_indices = @transform_1, window_bounds = array<i64: 1, 128>}, {pipeline_mode = #tpu.pipeline_mode<synchronous>, transform_indices = @transform_2, window_bounds = array<i64: 1, 128>}, {transform_indices = @transform_3, window_bounds = array<i64: 8, 128>}]} {
    %c0 = arith.constant 0 : index
    %c0_0 = arith.constant 0 : index
    %0 = vector.load %arg1[%c0, %c0_0] : memref<8x1xf32, #tpu.memory_space<vmem>>, vector<8x1xf32>
    %c0_1 = arith.constant 0 : index
    %c0_2 = arith.constant 0 : index
    %1 = vector.load %arg2[%c0_1, %c0_2] : memref<1x128xf32, #tpu.memory_space<vmem>>, vector<1x128xf32>
    %2 = vector.broadcast %0 : vector<8x1xf32> to vector<8x128xf32>
    %3 = vector.broadcast %1 : vector<1x128xf32> to vector<8x128xf32>
    %4 = arith.mulf %2, %3 : vector<8x128xf32>
    %c0_3 = arith.constant 0 : index
    %c0_4 = arith.constant 0 : index
    %5 = vector.load %arg3[%c0_3, %c0_4] : memref<1x128xf32, #tpu.memory_space<vmem>>, vector<1x128xf32>
    %6 = vector.broadcast %5 : vector<1x128xf32> to vector<8x128xf32>
    %7 = arith.addf %4, %6 : vector<8x128xf32>
    %cst = arith.constant 0.159154937 : f32
    %8 = vector.broadcast %cst : f32 to vector<8x128xf32>
    %9 = arith.mulf %7, %8 : vector<8x128xf32>
    %cst_5 = arith.constant 5.000000e-01 : f32
    %10 = vector.broadcast %cst_5 : f32 to vector<8x128xf32>
    %11 = arith.addf %9, %10 : vector<8x128xf32>
    %12 = math.floor %11 : vector<8x128xf32>
    %cst_6 = arith.constant 6.281250e+00 : f32
    %13 = vector.broadcast %cst_6 : f32 to vector<8x128xf32>
    %14 = arith.mulf %12, %13 : vector<8x128xf32>
    %15 = arith.subf %7, %14 : vector<8x128xf32>
    %cst_7 = arith.constant 0.00193530717 : f32
    %16 = vector.broadcast %cst_7 : f32 to vector<8x128xf32>
    %17 = arith.mulf %12, %16 : vector<8x128xf32>
    %18 = arith.subf %15, %17 : vector<8x128xf32>
    %19 = math.sin %18 : vector<8x128xf32>
    %c0_8 = arith.constant 0 : index
    %c0_9 = arith.constant 0 : index
    %20 = vector.load %arg4[%c0_8, %c0_9] : memref<8x128xf32, #tpu.memory_space<vmem>>, vector<8x128xf32>
    tpu.vector_store %arg4[%c0_8, %c0_9], %19 {strides = array<i32>} : memref<8x128xf32, #tpu.memory_space<vmem>>, vector<8x128xf32>,
    return
  }
  func.func @transform_0(%arg0: i32) -> (i32, i32) {
    %c0_i32 = arith.constant 0 : i32
    %c0_i32_0 = arith.constant 0 : i32
    return %arg0, %c0_i32 : i32, i32
  }
  func.func @transform_1(%arg0: i32) -> (i32, i32) {
    %c0_i32 = arith.constant 0 : i32
    %c0_i32_0 = arith.constant 0 : i32
    %c0_i32_1 = arith.constant 0 : i32
    return %c0_i32, %c0_i32_0 : i32, i32
  }
  func.func @transform_2(%arg0: i32) -> (i32, i32) {
    %c0_i32 = arith.constant 0 : i32
    %c0_i32_0 = arith.constant 0 : i32
    %c0_i32_1 = arith.constant 0 : i32
    return %c0_i32, %c0_i32_0 : i32, i32
  }
  func.func @transform_3(%arg0: i32) -> (i32, i32) {
    %c0_i32 = arith.constant 0 : i32
    %c0_i32_0 = arith.constant 0 : i32
    return %arg0, %c0_i32 : i32, i32
  }
}

</mosaic_0001>

<bundles_post_ra>
// kernel: tpu_custom_call.1
= control target key start
LH: loop header
LB: loop body
LE: loop exit
PB: predicated region body
PF: predicated region fallthrough
CT: control target
= control target key end

     0   :  { %v208_v1 = vmov 0   ;;  %s269_s0 = inlined_call_operand.vmem [shape: f32[8,1], index: 0, kind: input, shape index: {}]   ;;  %s270_s1 = inlined_call_operand.vmem [shape: f32[1,128], index: 1, kind: input, shape index: {}]   ;;  %s271_s2 = inlined_call_operand.vmem [shape: f32[1,128], index: 2, kind: input, shape index: {}]   ;;  %s272_s3 = inlined_call_operand.hbm [shape: f32[8,128], index: 3, kind: output, shape index: {}]  }
   0x1   :  { %v15_v0 = vld [vmem:[%s269_s0] sm:$0xff]  ;;  %181 = vset.pattern.permute.xlu0 %v208_v1 }
   0x2   :  { %8 = vsyncpa [#allocation3], 0  ;;  %19 = vperm.xlu0 %181, %v15_v0   ;;  %v163_v2 = vld [vmem:[%s270_s1] ss:$0 sm:$0xff]  ;;  %v209_v24 = vmov 683565275  }
   0x3   :  { %v164_v3 = vld [vmem:[%s271_s2] ss:$0 sm:$0xff]  ;;  %v210_v26 = vmov 2475754826   ;;  %v211_v29 = vmov 2131351028  }
   0x4   :  { %v212_v32 = vmov 2102212464   ;;  %v213_v35 = vmov 920167782   ;;  %v214_v38 = vmov 1326507024  }
   0x5   :  { %s215_s0 = smov [#allocation2]  }
   0x6   :  { %s155_s1 = sshll.u32 %s215_s0, 4  ;;  %s156_s1 = int_to_ptr.vmem [resolvable:$true] %s155_s1 }
   0x7   :  { %s186_s2 = scalar_lea.vmem %s156_s1, 128  ;;  %p191_p1 = scmp.lt.s32.totalorder %s156_s1, %s156_s1 }
   0x8   :  { %p187_p0 = scmp.ne.s32.totalorder %s156_s1, %s186_s2  ;;  %p192_p2 = scmp.lt.s32.totalorder %s186_s2, %s186_s2 }
   0xa   :  { %p193_p3 = por %p192_p2, %p191_p1 }
   0xc   :  { %p194_p4 = pnand %p193_p3, %p187_p0 }
  0x7d   :  { %v20_v4 = vpop.permute.xlu0 %19 }
  0x7e   :  { %v28_v5 = vmul.f32 %v163_v2, %v20_v4 }
  0x80   :  { %v36_v6 = vadd.f32 %v164_v3, %v28_v5 }
  0x82   :  { %v37_v7 = vmul.f32 0.15915494, %v36_v6 }
  0x84   :  { %v38_v8 = vadd.f32 0.5, %v37_v7 }
  0x86   :  { %v39_v9 = vfloor.f32 %v38_v8 }
  0x88   :  { %v40_v10 = vmul.f32 6.28125, %v39_v9  ;;  %v42_v12 = vmul.f32 0.0019353072, %v39_v9 }
  0x8a   :  { %v41_v11 = vsub.f32 %v36_v6, %v40_v10 }
  0x8c   :  { %v245_v13 = vsub.f32 %v41_v11, %v42_v12 }
  0x8e   :  { %v47_v14 = vand.u32 2139095040, %v245_v13  ;;  %v44_v18 = vand.u32 2147483647, %v245_v13  ;;  %vm46_vm7 = vcmp.lt.s32.totalorder %v245_v13, 0  ;;  %vm136_vm12 = vweird.f32 %v245_v13 }
  0x90   :  { %v48_v15 = vshrl.u32 %v47_v14, 23  ;;  %v51_v22 = vand.u32 8388607, %v44_v18  ;;  %vm45_vm8 = vcmp.le.f32.partialorder %v44_v18, 0.7853982 }
  0x92   :  { %v165_v16 = vadd.s32 4294967169, %v48_v15  ;;  %v52_v40 = vor.u32 8388608, %v51_v22 }
  0x94   :  { %v54_v17 = vadd.s32 1, %v165_v16  ;;  %v92_v54 = vshll.u32 %v52_v40, 8 }
  0x96   :  { %vm55_vm0 = vcmp.gt.s32.totalorder %v54_v17, 0 }
  0x97   :  { %v56_v19 = vsel %vm55_vm0, %v54_v17, 0 }
  0x98   :  { %v58_v20 = vand.u32 31, %v56_v19  ;;  %v57_v23 = vshrl.u32 %v56_v19, 5 }
  0x9a   :  { %v59_v21 = vsub.s32 32, %v58_v20  ;;  %v61_v25 = vshll.u32 %v209_v24, %v58_v20  ;;  %v64_v27 = vshll.u32 %v210_v26, %v58_v20  ;;  %v67_v31 = vshll.u32 %v211_v29, %v58_v20 }
  0x9b   :  { %v70_v34 = vshll.u32 %v212_v32, %v58_v20  ;;  %v73_v37 = vshll.u32 %v213_v35, %v58_v20  ;;  %vm76_vm1 = vcmp.lt.s32.totalorder %v57_v23, 1  ;;  %vm79_vm2 = vcmp.lt.s32.totalorder %v57_v23, 4 }
  0x9c   :  { %v62_v28 = vshrl.u32 %v210_v26, %v59_v21  ;;  %v65_v30 = vshrl.u32 %v211_v29, %v59_v21  ;;  %v68_v33 = vshrl.u32 %v212_v32, %v59_v21  ;;  %v71_v36 = vshrl.u32 %v213_v35, %v59_v21 }
  0x9d   :  { %v74_v39 = vshrl.u32 %v214_v38, %v59_v21  ;;  %v60_v49 = vshrl.u32 %v209_v24, %v59_v21  ;;  %vm78_vm3 = vcmp.lt.s32.totalorder %v57_v23, 3  ;;  %vm77_vm4 = vcmp.lt.s32.totalorder %v57_v23, 2 }
  0x9e   :  { %v63_v41 = vor.u32 %v62_v28, %v61_v25  ;;  %v66_v42 = vor.u32 %v65_v30, %v64_v27  ;;  %v69_v43 = vor.u32 %v68_v33, %v67_v31  ;;  %v72_v44 = vor.u32 %v71_v36, %v70_v34 }
  0x9f   :  { %v75_v45 = vor.u32 %v74_v39, %v73_v37 }
  0xa0   :  { %v81_v46 = vsel %vm79_vm2, %v69_v43, 2102212464  ;;  %v84_v47 = vsel %vm76_vm1, %v63_v41, %v66_v42  ;;  %v88_v48 = vsel %vm76_vm1, %v66_v42, %v69_v43  ;;  %v85_v50 = vsel %vm79_vm2, %v72_v44, 920167782 }
  0xa1   :  { %v89_v51 = vsel %vm79_vm2, %v75_v45, 1326507024  ;;  %v86_v52 = vsel %vm78_vm3, %v69_v43, %v85_v50  ;;  %v80_v55 = vsel %vm76_vm1, %v60_v49, %v63_v41  ;;  %v82_v56 = vsel %vm78_vm3, %v66_v42, %v81_v46 }
  0xa2   :  { %v90_v53 = vsel %vm78_vm3, %v72_v44, %v89_v51  ;;  %v87_v57 = vsel %vm77_vm4, %v84_v47, %v86_v52  ;;  %v83_v63 = vsel %vm77_vm4, %v80_v55, %v82_v56 }
  0xa3   :  { %v91_v58 = vsel %vm77_vm4, %v88_v48, %v90_v53  ;;  %v254_v61 = vmul.u32.u64.low %v92_v54, %v87_v57  ;;  %v255_v62 = vmul.u32.u64.high %v92_v54, %v87_v57, %v254_v61  ;;  %v99_v1 = vmul.u32 %v92_v54, %v83_v63 }
  0xa4   :  { %v251_v59 = vmul.u32.u64.low %v92_v54, %v91_v58  ;;  %v252_v60 = vmul.u32.u64.high %v92_v54, %v91_v58, %v251_v59 }
  0xa5   :  { %v102_v0 = vadd.s32 1, %v255_v62 }
  0xa6   :  { %vm101_vm5 = vc.u32 %v252_v60, %v254_v61  ;;  %v100_v14 = vadd.s32 %v254_v61, %v252_v60 }
  0xa7   :  { %v103_v2 = vsel %vm101_vm5, %v102_v0, %v255_v62 }
  0xa8   :  { %v104_v3 = vadd.s32 %v103_v2, %v99_v1 }
  0xaa   :  { %v105_v4 = vadd.s32 536870912, %v104_v3 }
  0xac   :  { %v106_v5 = vshrl.u32 %v105_v4, 30 }
  0xae   :  { %v107_v6 = vshll.u32 %v106_v5, 30  ;;  %v130_v28 = vsub.s32 4, %v106_v5 }
  0xb0   :  { %v108_v7 = vsub.s32 %v104_v3, %v107_v6  ;;  %v131_v31 = vsel %vm46_vm7, %v130_v28, %v106_v5 }
  0xb1   :  { %v133_v32 = vsel %vm45_vm8, 0, %v131_v31 }
  0xb2   :  { %v110_v8 = vsub.s32 0, %v108_v7  ;;  %v137_v33 = vadd.s32 3, %v133_v32 }
  0xb4   :  { %v166_v9 = vmin.u32 %v110_v8, %v108_v7  ;;  %v138_v34 = vand.u32 3, %v137_v33 }
  0xb6   :  { %v112_v10 = vclz %v166_v9  ;;  %vm143_vm9 = vcmp.eq.s32.totalorder %v138_v34, 2  ;;  %vm140_vm10 = vcmp.eq.s32.totalorder %v138_v34, 0  ;;  %vm139_vm11 = vcmp.lt.s32.totalorder %v138_v34, 2 }
  0xb8   :  { %v167_v11 = vadd.s32 4294967294, %v112_v10 }
  0xba   :  { %vm168_vm6 = vcmp.lt.s32.totalorder %v167_v11, 0 }
  0xbb   :  { %v115_v12 = vsel %vm168_vm6, 0, %v167_v11 }
  0xbc   :  { %v116_v15 = vsub.s32 32, %v115_v12  ;;  %v120_v16 = vsub.s32 4294967266, %v115_v12  ;;  %v117_v17 = vshll.u32 %v108_v7, %v115_v12 }
  0xbe   :  { %v118_v19 = vshrl.u32 %v100_v14, %v116_v15  ;;  %v121_v20 = vadd.s32 127, %v120_v16 }
  0xc0   :  { %v119_v21 = vor.u32 %v118_v19, %v117_v17  ;;  %v122_v22 = vshll.u32 %v121_v20, 23 }
  0xc2   :  { %v123_v23 = vor.u32 4788187, %v122_v22  ;;  %v126_v25 = vcvt.s32.f32 %v119_v21 }
  0xc4   :  { %v124_v24 = vand.u32 2147483647, %v123_v23 }
  0xc6   :  { %v127_v26 = vmul.f32 %v126_v25, %v124_v24 }
  0xc8   :  { %v128_v27 = vxor.u32 2147483648, %v127_v26 }
  0xca   :  { %v129_v29 = vsel %vm46_vm7, %v128_v27, %v127_v26 }
  0xcb   :  { %v132_v30 = vsel %vm45_vm8, %v245_v13, %v129_v29 }
  0xcc   :  { %182 = vcosq.f32 %v132_v30 }
  0xcd   :  { %184 = vsinq.f32 %v132_v30 }
  0xd9   :  { %v183_v35 = vpop.eup %182 }
  0xda   :  { %v185_v36 = vpop.eup %184  ;;  %v144_v37 = vxor.u32 2147483648, %v183_v35 }
  0xdb   :  { %v141_v38 = vxor.u32 2147483648, %v185_v36 }
  0xdc   :  { %v145_v39 = vsel %vm143_vm9, %v144_v37, %v185_v36 }
  0xdd   :  { %v142_v18 = vsel %vm140_vm10, %v183_v35, %v141_v38 }
  0xde   :  { %v146_v40 = vsel %vm139_vm11, %v142_v18, %v145_v39 }
  0xdf   :  { %v147_v41 = vsel %vm136_vm12, nan, %v146_v40 }
  0xe0   :  { %148 = vst [vmem:[#allocation2] sm:$0xff] %v147_v41 }
  0xe1   :  { %197 = shalt.err (!%p194_p4)
}
  0xe2   :  { %158 = dma.vmem_to_hbm [thread:$0]  %s156_s1, 128, %s272_s3, [#allocation3]  }
  0xe3   :  { %206 = dma.done.wait [#allocation3], 128  }
  0xe4   :  { %207 = vsyncadd [#allocation3], 4294967168 }
  0xe5   :  { %162 = vsyncpa [#allocation3], 1 }

</bundles_post_ra>
